<compile_context>
chip_gen: v5e
topology: v5e:2x2
jax: 0.10.0
libtpu: 0.0.40
codegen_flags: <defaults>
</compile_context>

<pallas_src>
import jax
import jax.numpy as jnp
from jax.experimental import pallas as pl
from jax.experimental.pallas import tpu as pltpu

N_COMPONENTS = 2            # n_components (== hidden_size of the module)
IN_FEATURES = 3             # hidden Linear in_features (1 x-feature + 2 hidden)
HIDDEN_FEATURES = 4         # hidden Linear out_features


def _var_rnn_seq_kernel(x_ref, h0_ref, wh_ref, bh_ref, wo_ref, bo_ref,
                        out_ref, hid_ref):
    """Fused recurrence: loops over all T timesteps of one batch tile in VMEM."""
    # ---- loop-invariant loads: weights stay resident for the whole sequence ----
    wh = wh_ref[...]                                     # (3, 4)
    wh_x, wh_h0, wh_h1 = wh[0:1, :], wh[1:2, :], wh[2:3, :]
    bh = bh_ref[...]                                     # (1, 4)
    wo = wo_ref[...]                                     # (4, 2)
    wo0, wo1, wo2, wo3 = wo[0:1, :], wo[1:2, :], wo[2:3, :], wo[3:4, :]
    bo = bo_ref[...]                                     # (1, 2)

    T = x_ref.shape[0]
    hid_ref[...] = h0_ref[...]                           # (B, 2) recurrent state in VMEM

    def step(t, carry):
        x_t = x_ref[t]                                   # (B, 1) dynamic first-axis load
        hid = hid_ref[...]                               # (B, 2)

        # hidden Linear(3 -> 4): explicit VPU broadcast-MACs (cat(x, hidden) is implicit)
        h = x_t * wh_x + hid[:, 0:1] * wh_h0 + hid[:, 1:2] * wh_h1 + bh       # (B, 4)

        # cat((h0, tanh(h1), h2, tanh(h3))) fused into the output Linear(4 -> 2)
        o = (h[:, 0:1] * wo0 + jnp.tanh(h[:, 1:2]) * wo1
             + h[:, 2:3] * wo2 + jnp.tanh(h[:, 3:4]) * wo3 + bo)              # (B, 2)

        # elu(o) + 1 + 1e-15 ; for o <= 0: (exp(o) - 1) + 1 == exp(o), no cancellation
        out = jnp.where(o > 0.0, o + 1.0, jnp.exp(o)) + 1e-15

        out_ref[t] = out                                 # per-step output
        hid_ref[...] = out                               # output feeds the next step
        return carry

    jax.lax.fori_loop(0, T, step, 0, unroll=T <= 16)


def variance_recurrent_sequence(x_seq, h0, params):
    """Run the recurrence for a whole sequence in ONE pallas_call.

    x_seq: (T, B, 1) float32  -- per-step scalar input for each of B sequences
    h0:    (B, n_components)  -- initial hidden state per sequence
    returns (T, B, n_components) -- the per-step outputs (output_t is hidden_{t+1})
    """
    wh, bh, wo, bo = params
    x_seq = x_seq.astype(jnp.float32)
    h0 = h0.astype(jnp.float32)
    T, B, _ = x_seq.shape
    n = h0.shape[-1]
    b_tile = 8 if B % 8 == 0 else B                      # fill the 8 sublanes
    grid = (B // b_tile,)                                # batch tiles -> 'parallel'

    flops = int(T * B * 50)                              # ~50 VPU flops / row / step
    transcendentals = int(T * B * 4)                     # 2 tanh + <=2 exp / row / step
    bytes_accessed = int(4 * (x_seq.size + h0.size + wh.size + bh.size
                              + wo.size + bo.size + T * B * n))

    return pl.pallas_call(
        _var_rnn_seq_kernel,
        out_shape=jax.ShapeDtypeStruct((T, B, n), jnp.float32),
        grid_spec=pltpu.PrefetchScalarGridSpec(
            num_scalar_prefetch=0,
            grid=grid,
            in_specs=[
                pl.BlockSpec((T, b_tile, 1), lambda b: (0, b, 0)),           # x
                pl.BlockSpec((b_tile, n), lambda b: (b, 0)),                 # h0
                pl.BlockSpec((IN_FEATURES, HIDDEN_FEATURES), lambda b: (0, 0)),   # wh
                pl.BlockSpec((1, HIDDEN_FEATURES), lambda b: (0, 0)),        # bh
                pl.BlockSpec((HIDDEN_FEATURES, n), lambda b: (0, 0)),        # wo
                pl.BlockSpec((1, n), lambda b: (0, 0)),                      # bo
            ],
            out_specs=pl.BlockSpec((T, b_tile, n), lambda b: (0, b, 0)),
            scratch_shapes=[pltpu.VMEM((b_tile, n), jnp.float32)],           # hidden state
        ),
        compiler_params=pltpu.CompilerParams(dimension_semantics=("parallel",)),
        cost_estimate=pl.CostEstimate(flops=flops,
                                      transcendentals=transcendentals,
                                      bytes_accessed=bytes_accessed),
    )(x_seq, h0, wh, bh, wo, bo)


def variance_recurrent_forward(x, hidden_state, params):
    """Faithful single-step forward (original module signature).

    x: (1,) ; hidden_state: (1, n_components) ; returns (n_components,)."""
    x_seq = jnp.reshape(x.astype(jnp.float32), (1, 1, 1))
    h0 = jnp.reshape(hidden_state.astype(jnp.float32), (1, N_COMPONENTS))
    out = variance_recurrent_sequence(x_seq, h0, params)
    return out[0, 0]


def init_params(key):
    """PyTorch-style default Linear init U(-k, k), k = 1/sqrt(fan_in).
    Weights stored transposed as (in_features, out_features)."""
    k1, k2, k3, k4 = jax.random.split(key, 4)
    kh = 1.0 / jnp.sqrt(float(IN_FEATURES))
    ko = 1.0 / jnp.sqrt(float(HIDDEN_FEATURES))
    wh = jax.random.uniform(k1, (IN_FEATURES, HIDDEN_FEATURES), jnp.float32, -kh, kh)
    bh = jax.random.uniform(k2, (1, HIDDEN_FEATURES), jnp.float32, -kh, kh)
    wo = jax.random.uniform(k3, (HIDDEN_FEATURES, N_COMPONENTS), jnp.float32, -ko, ko)
    bo = jax.random.uniform(k4, (1, N_COMPONENTS), jnp.float32, -ko, ko)
    return wh, bh, wo, bo


# ----------------------------- pure-JAX references -----------------------------
def _step_reference(x_scalar, hid_row, params):
    """Literal translation of VarianceRecurrentNetwork.forward for one step/row."""
    wh, bh, wo, bo = params
    xc = jnp.concatenate([jnp.reshape(x_scalar, (1,)),
                          jnp.reshape(hid_row, (-1,))], axis=0).astype(jnp.float32)
    h = xc @ wh + bh[0]
    h = jnp.concatenate([h[0:1], jnp.tanh(h[1:2]), h[2:3], jnp.tanh(h[3:])], axis=0)
    o = h @ wo + bo[0]
    elu = jnp.where(o > 0.0, o, jnp.exp(o) - 1.0)
    return elu + 1.0 + 1e-15


def _sequence_reference(x_seq, h0, params):
    T, B, _ = x_seq.shape
    hid = h0
    outs = []
    for t in range(T):
        rows = [_step_reference(x_seq[t, b, 0], hid[b], params) for b in range(B)]
        out_t = jnp.stack(rows, axis=0)
        outs.append(out_t)
        hid = out_t
    return jnp.stack(outs, axis=0)


if __name__ == "__main__":
    key = jax.random.PRNGKey(0)
    kp, kx, kd, kx1 = jax.random.split(key, 4)

    params = init_params(kp)

    # Batched fused recurrence: B = 8 independent sequences, T = 8 timesteps.
    B, T = 8, 8
    x_seq = jax.random.normal(kx, (T, B, 1), jnp.float32)
    data = jax.random.normal(kd, (16,), jnp.float32)
    h0 = jnp.var(data) * jnp.ones((B, N_COMPONENTS), jnp.float32)   # init_hidden(data)

    out_seq = jax.block_until_ready(variance_recurrent_sequence(x_seq, h0, params))
    ref_seq = _sequence_reference(x_seq, h0, params)
    assert out_seq.shape == (T, B, N_COMPONENTS)
    assert jnp.allclose(out_seq, ref_seq, atol=1e-5, rtol=1e-5), (out_seq, ref_seq)

    # Single-step call with the original module signature.
    x1 = jax.random.normal(kx1, (1,), jnp.float32)
    h1 = jnp.var(data) * jnp.ones((1, N_COMPONENTS), jnp.float32)
    out1 = jax.block_until_ready(variance_recurrent_forward(x1, h1, params))
    ref1 = _step_reference(x1[0], h1[0], params)
    assert out1.shape == (N_COMPONENTS,)
    assert jnp.allclose(out1, ref1, atol=1e-5, rtol=1e-5), (out1, ref1)

    print("KERNEL_OK")
</pallas_src>

<mosaic_0001>
module attributes {stable_mosaic.version = 11 : i64} {
  func.func @_var_rnn_seq_kernel(%arg0: i32, %arg1: memref<8x8x1xf32, #tpu.memory_space<vmem>>, %arg2: memref<8x2xf32, #tpu.memory_space<vmem>>, %arg3: memref<3x4xf32, #tpu.memory_space<vmem>>, %arg4: memref<1x4xf32, #tpu.memory_space<vmem>>, %arg5: memref<4x2xf32, #tpu.memory_space<vmem>>, %arg6: memref<1x2xf32, #tpu.memory_space<vmem>>, %arg7: memref<8x8x2xf32, #tpu.memory_space<vmem>>, %arg8: memref<8x2xf32, #tpu.memory_space<vmem>>) attributes {dimension_semantics = [#tpu.dimension_semantics<parallel>], iteration_bounds = array<i64: 1>, scalar_prefetch = 0 : i64, scratch_operands = 1 : i64, tpu.core_type = #tpu.core_type<tc>, window_params = [{transform_indices = @transform_0, window_bounds = array<i64: 8, 8, 1>}, {transform_indices = @transform_1, window_bounds = array<i64: 8, 2>}, {pipeline_mode = #tpu.pipeline_mode<synchronous>, transform_indices = @transform_2, window_bounds = array<i64: 3, 4>}, {pipeline_mode = #tpu.pipeline_mode<synchronous>, transform_indices = @transform_3, window_bounds = array<i64: 1, 4>}, {pipeline_mode = #tpu.pipeline_mode<synchronous>, transform_indices = @transform_4, window_bounds = array<i64: 4, 2>}, {pipeline_mode = #tpu.pipeline_mode<synchronous>, transform_indices = @transform_5, window_bounds = array<i64: 1, 2>}, {transform_indices = @transform_6, window_bounds = array<i64: 8, 8, 2>}]} {
    %c0 = arith.constant 0 : index
    %c0_0 = arith.constant 0 : index
    %0 = vector.load %arg3[%c0, %c0_0] : memref<3x4xf32, #tpu.memory_space<vmem>>, vector<3x4xf32>
    %1 = vector.extract_strided_slice %0 {offsets = [0, 0], sizes = [1, 4], strides = [1, 1]} : vector<3x4xf32> to vector<1x4xf32>
    %2 = vector.extract_strided_slice %0 {offsets = [1, 0], sizes = [1, 4], strides = [1, 1]} : vector<3x4xf32> to vector<1x4xf32>
    %3 = vector.extract_strided_slice %0 {offsets = [2, 0], sizes = [1, 4], strides = [1, 1]} : vector<3x4xf32> to vector<1x4xf32>
    %c0_1 = arith.constant 0 : index
    %c0_2 = arith.constant 0 : index
    %4 = vector.load %arg4[%c0_1, %c0_2] : memref<1x4xf32, #tpu.memory_space<vmem>>, vector<1x4xf32>
    %c0_3 = arith.constant 0 : index
    %c0_4 = arith.constant 0 : index
    %5 = vector.load %arg5[%c0_3, %c0_4] : memref<4x2xf32, #tpu.memory_space<vmem>>, vector<4x2xf32>
    %6 = vector.extract_strided_slice %5 {offsets = [0, 0], sizes = [1, 2], strides = [1, 1]} : vector<4x2xf32> to vector<1x2xf32>
    %7 = vector.extract_strided_slice %5 {offsets = [1, 0], sizes = [1, 2], strides = [1, 1]} : vector<4x2xf32> to vector<1x2xf32>
    %8 = vector.extract_strided_slice %5 {offsets = [2, 0], sizes = [1, 2], strides = [1, 1]} : vector<4x2xf32> to vector<1x2xf32>
    %9 = vector.extract_strided_slice %5 {offsets = [3, 0], sizes = [1, 2], strides = [1, 1]} : vector<4x2xf32> to vector<1x2xf32>
    %c0_5 = arith.constant 0 : index
    %c0_6 = arith.constant 0 : index
    %10 = vector.load %arg6[%c0_5, %c0_6] : memref<1x2xf32, #tpu.memory_space<vmem>>, vector<1x2xf32>
    %c0_7 = arith.constant 0 : index
    %c0_8 = arith.constant 0 : index
    %11 = vector.load %arg2[%c0_7, %c0_8] : memref<8x2xf32, #tpu.memory_space<vmem>>, vector<8x2xf32>
    %c0_9 = arith.constant 0 : index
    %c0_10 = arith.constant 0 : index
    %12 = vector.load %arg8[%c0_9, %c0_10] : memref<8x2xf32, #tpu.memory_space<vmem>>, vector<8x2xf32>
    tpu.vector_store %arg8[%c0_9, %c0_10], %11 {strides = array<i32>} : memref<8x2xf32, #tpu.memory_space<vmem>>, vector<8x2xf32>,
    %c0_i32 = arith.constant 0 : i32
    %13 = arith.index_cast %c0_i32 : i32 to index
    %c0_11 = arith.constant 0 : index
    %c0_12 = arith.constant 0 : index
    %14 = vector.load %arg1[%13, %c0_11, %c0_12] : memref<8x8x1xf32, #tpu.memory_space<vmem>>, vector<1x8x1xf32>
    %15 = vector.shape_cast %14 : vector<1x8x1xf32> to vector<8x1xf32>
    %c0_13 = arith.constant 0 : index
    %c0_14 = arith.constant 0 : index
    %16 = vector.load %arg8[%c0_13, %c0_14] : memref<8x2xf32, #tpu.memory_space<vmem>>, vector<8x2xf32>
    %17 = vector.broadcast %15 : vector<8x1xf32> to vector<8x4xf32>
    %18 = vector.broadcast %1 : vector<1x4xf32> to vector<8x4xf32>
    %19 = arith.mulf %17, %18 : vector<8x4xf32>
    %20 = vector.extract_strided_slice %16 {offsets = [0, 0], sizes = [8, 1], strides = [1, 1]} : vector<8x2xf32> to vector<8x1xf32>
    %21 = vector.broadcast %20 : vector<8x1xf32> to vector<8x4xf32>
    %22 = vector.broadcast %2 : vector<1x4xf32> to vector<8x4xf32>
    %23 = arith.mulf %21, %22 : vector<8x4xf32>
    %24 = arith.addf %19, %23 : vector<8x4xf32>
    %25 = vector.extract_strided_slice %16 {offsets = [0, 1], sizes = [8, 1], strides = [1, 1]} : vector<8x2xf32> to vector<8x1xf32>
    %26 = vector.broadcast %25 : vector<8x1xf32> to vector<8x4xf32>
    %27 = vector.broadcast %3 : vector<1x4xf32> to vector<8x4xf32>
    %28 = arith.mulf %26, %27 : vector<8x4xf32>
    %29 = arith.addf %24, %28 : vector<8x4xf32>
    %30 = vector.broadcast %4 : vector<1x4xf32> to vector<8x4xf32>
    %31 = arith.addf %29, %30 : vector<8x4xf32>
    %32 = vector.extract_strided_slice %31 {offsets = [0, 0], sizes = [8, 1], strides = [1, 1]} : vector<8x4xf32> to vector<8x1xf32>
    %33 = vector.broadcast %32 : vector<8x1xf32> to vector<8x2xf32>
    %34 = vector.broadcast %6 : vector<1x2xf32> to vector<8x2xf32>
    %35 = arith.mulf %33, %34 : vector<8x2xf32>
    %36 = vector.extract_strided_slice %31 {offsets = [0, 1], sizes = [8, 1], strides = [1, 1]} : vector<8x4xf32> to vector<8x1xf32>
    %37 = math.tanh %36 : vector<8x1xf32>
    %38 = vector.broadcast %37 : vector<8x1xf32> to vector<8x2xf32>
    %39 = vector.broadcast %7 : vector<1x2xf32> to vector<8x2xf32>
    %40 = arith.mulf %38, %39 : vector<8x2xf32>
    %41 = arith.addf %35, %40 : vector<8x2xf32>
    %42 = vector.extract_strided_slice %31 {offsets = [0, 2], sizes = [8, 1], strides = [1, 1]} : vector<8x4xf32> to vector<8x1xf32>
    %43 = vector.broadcast %42 : vector<8x1xf32> to vector<8x2xf32>
    %44 = vector.broadcast %8 : vector<1x2xf32> to vector<8x2xf32>
    %45 = arith.mulf %43, %44 : vector<8x2xf32>
    %46 = arith.addf %41, %45 : vector<8x2xf32>
    %47 = vector.extract_strided_slice %31 {offsets = [0, 3], sizes = [8, 1], strides = [1, 1]} : vector<8x4xf32> to vector<8x1xf32>
    %48 = math.tanh %47 : vector<8x1xf32>
    %49 = vector.broadcast %48 : vector<8x1xf32> to vector<8x2xf32>
    %50 = vector.broadcast %9 : vector<1x2xf32> to vector<8x2xf32>
    %51 = arith.mulf %49, %50 : vector<8x2xf32>
    %52 = arith.addf %46, %51 : vector<8x2xf32>
    %53 = vector.broadcast %10 : vector<1x2xf32> to vector<8x2xf32>
    %54 = arith.addf %52, %53 : vector<8x2xf32>
    %cst = arith.constant 0.000000e+00 : f32
    %55 = vector.broadcast %cst : f32 to vector<8x2xf32>
    %56 = arith.cmpf ogt, %54, %55 : vector<8x2xf32>
    %cst_15 = arith.constant 1.000000e+00 : f32
    %57 = vector.broadcast %cst_15 : f32 to vector<8x2xf32>
    %58 = arith.addf %54, %57 : vector<8x2xf32>
    %59 = math.exp %54 : vector<8x2xf32>
    %60 = arith.select %56, %58, %59 : vector<8x2xi1>, vector<8x2xf32>
    %cst_16 = arith.constant 1.000000e-15 : f32
    %61 = vector.broadcast %cst_16 : f32 to vector<8x2xf32>
    %62 = arith.addf %60, %61 : vector<8x2xf32>
    %63 = arith.index_cast %c0_i32 : i32 to index
    %c0_17 = arith.constant 0 : index
    %c0_18 = arith.constant 0 : index
    %64 = vector.load %arg7[%63, %c0_17, %c0_18] : memref<8x8x2xf32, #tpu.memory_space<vmem>>, vector<1x8x2xf32>
    %65 = vector.shape_cast %64 : vector<1x8x2xf32> to vector<8x2xf32>
    %66 = vector.shape_cast %62 : vector<8x2xf32> to vector<1x8x2xf32>
    tpu.vector_store %arg7[%63, %c0_17, %c0_18], %66 {strides = array<i32>} : memref<8x8x2xf32, #tpu.memory_space<vmem>>, vector<1x8x2xf32>,
    %c0_19 = arith.constant 0 : index
    %c0_20 = arith.constant 0 : index
    %67 = vector.load %arg8[%c0_19, %c0_20] : memref<8x2xf32, #tpu.memory_space<vmem>>, vector<8x2xf32>
    tpu.vector_store %arg8[%c0_19, %c0_20], %62 {strides = array<i32>} : memref<8x2xf32, #tpu.memory_space<vmem>>, vector<8x2xf32>,
    %c1_i32 = arith.constant 1 : i32
    %68 = arith.index_cast %c1_i32 : i32 to index
    %c0_21 = arith.constant 0 : index
    %c0_22 = arith.constant 0 : index
    %69 = vector.load %arg1[%68, %c0_21, %c0_22] : memref<8x8x1xf32, #tpu.memory_space<vmem>>, vector<1x8x1xf32>
    %70 = vector.shape_cast %69 : vector<1x8x1xf32> to vector<8x1xf32>
    %c0_23 = arith.constant 0 : index
    %c0_24 = arith.constant 0 : index
    %71 = vector.load %arg8[%c0_23, %c0_24] : memref<8x2xf32, #tpu.memory_space<vmem>>, vector<8x2xf32>
    %72 = vector.broadcast %70 : vector<8x1xf32> to vector<8x4xf32>
    %73 = vector.broadcast %1 : vector<1x4xf32> to vector<8x4xf32>
    %74 = arith.mulf %72, %73 : vector<8x4xf32>
    %75 = vector.extract_strided_slice %71 {offsets = [0, 0], sizes = [8, 1], strides = [1, 1]} : vector<8x2xf32> to vector<8x1xf32>
    %76 = vector.broadcast %75 : vector<8x1xf32> to vector<8x4xf32>
    %77 = vector.broadcast %2 : vector<1x4xf32> to vector<8x4xf32>
    %78 = arith.mulf %76, %77 : vector<8x4xf32>
    %79 = arith.addf %74, %78 : vector<8x4xf32>
    %80 = vector.extract_strided_slice %71 {offsets = [0, 1], sizes = [8, 1], strides = [1, 1]} : vector<8x2xf32> to vector<8x1xf32>
    %81 = vector.broadcast %80 : vector<8x1xf32> to vector<8x4xf32>
    %82 = vector.broadcast %3 : vector<1x4xf32> to vector<8x4xf32>
    %83 = arith.mulf %81, %82 : vector<8x4xf32>
    %84 = arith.addf %79, %83 : vector<8x4xf32>
    %85 = vector.broadcast %4 : vector<1x4xf32> to vector<8x4xf32>
    %86 = arith.addf %84, %85 : vector<8x4xf32>
    %87 = vector.extract_strided_slice %86 {offsets = [0, 0], sizes = [8, 1], strides = [1, 1]} : vector<8x4xf32> to vector<8x1xf32>
    %88 = vector.broadcast %87 : vector<8x1xf32> to vector<8x2xf32>
    %89 = vector.broadcast %6 : vector<1x2xf32> to vector<8x2xf32>
    %90 = arith.mulf %88, %89 : vector<8x2xf32>
    %91 = vector.extract_strided_slice %86 {offsets = [0, 1], sizes = [8, 1], strides = [1, 1]} : vector<8x4xf32> to vector<8x1xf32>
    %92 = math.tanh %91 : vector<8x1xf32>
    %93 = vector.broadcast %92 : vector<8x1xf32> to vector<8x2xf32>
    %94 = vector.broadcast %7 : vector<1x2xf32> to vector<8x2xf32>
    %95 = arith.mulf %93, %94 : vector<8x2xf32>
    %96 = arith.addf %90, %95 : vector<8x2xf32>
    %97 = vector.extract_strided_slice %86 {offsets = [0, 2], sizes = [8, 1], strides = [1, 1]} : vector<8x4xf32> to vector<8x1xf32>
    %98 = vector.broadcast %97 : vector<8x1xf32> to vector<8x2xf32>
    %99 = vector.broadcast %8 : vector<1x2xf32> to vector<8x2xf32>
    %100 = arith.mulf %98, %99 : vector<8x2xf32>
    %101 = arith.addf %96, %100 : vector<8x2xf32>
    %102 = vector.extract_strided_slice %86 {offsets = [0, 3], sizes = [8, 1], strides = [1, 1]} : vector<8x4xf32> to vector<8x1xf32>
    %103 = math.tanh %102 : vector<8x1xf32>
    %104 = vector.broadcast %103 : vector<8x1xf32> to vector<8x2xf32>
    %105 = vector.broadcast %9 : vector<1x2xf32> to vector<8x2xf32>
    %106 = arith.mulf %104, %105 : vector<8x2xf32>
    %107 = arith.addf %101, %106 : vector<8x2xf32>
    %108 = vector.broadcast %10 : vector<1x2xf32> to vector<8x2xf32>
    %109 = arith.addf %107, %108 : vector<8x2xf32>
    %cst_25 = arith.constant 0.000000e+00 : f32
    %110 = vector.broadcast %cst_25 : f32 to vector<8x2xf32>
    %111 = arith.cmpf ogt, %109, %110 : vector<8x2xf32>
    %cst_26 = arith.constant 1.000000e+00 : f32
    %112 = vector.broadcast %cst_26 : f32 to vector<8x2xf32>
    %113 = arith.addf %109, %112 : vector<8x2xf32>
    %114 = math.exp %109 : vector<8x2xf32>
    %115 = arith.select %111, %113, %114 : vector<8x2xi1>, vector<8x2xf32>
    %cst_27 = arith.constant 1.000000e-15 : f32
    %116 = vector.broadcast %cst_27 : f32 to vector<8x2xf32>
    %117 = arith.addf %115, %116 : vector<8x2xf32>
    %118 = arith.index_cast %c1_i32 : i32 to index
    %c0_28 = arith.constant 0 : index
    %c0_29 = arith.constant 0 : index
    %119 = vector.load %arg7[%118, %c0_28, %c0_29] : memref<8x8x2xf32, #tpu.memory_space<vmem>>, vector<1x8x2xf32>
    %120 = vector.shape_cast %119 : vector<1x8x2xf32> to vector<8x2xf32>
    %121 = vector.shape_cast %117 : vector<8x2xf32> to vector<1x8x2xf32>
    tpu.vector_store %arg7[%118, %c0_28, %c0_29], %121 {strides = array<i32>} : memref<8x8x2xf32, #tpu.memory_space<vmem>>, vector<1x8x2xf32>,
    %c0_30 = arith.constant 0 : index
    %c0_31 = arith.constant 0 : index
    %122 = vector.load %arg8[%c0_30, %c0_31] : memref<8x2xf32, #tpu.memory_space<vmem>>, vector<8x2xf32>
    tpu.vector_store %arg8[%c0_30, %c0_31], %117 {strides = array<i32>} : memref<8x2xf32, #tpu.memory_space<vmem>>, vector<8x2xf32>,
    %c2_i32 = arith.constant 2 : i32
    %123 = arith.index_cast %c2_i32 : i32 to index
    %c0_32 = arith.constant 0 : index
    %c0_33 = arith.constant 0 : index
    %124 = vector.load %arg1[%123, %c0_32, %c0_33] : memref<8x8x1xf32, #tpu.memory_space<vmem>>, vector<1x8x1xf32>
    %125 = vector.shape_cast %124 : vector<1x8x1xf32> to vector<8x1xf32>
    %c0_34 = arith.constant 0 : index
    %c0_35 = arith.constant 0 : index
    %126 = vector.load %arg8[%c0_34, %c0_35] : memref<8x2xf32, #tpu.memory_space<vmem>>, vector<8x2xf32>
    %127 = vector.broadcast %125 : vector<8x1xf32> to vector<8x4xf32>
    %128 = vector.broadcast %1 : vector<1x4xf32> to vector<8x4xf32>
    %129 = arith.mulf %127, %128 : vector<8x4xf32>
    %130 = vector.extract_strided_slice %126 {offsets = [0, 0], sizes = [8, 1], strides = [1, 1]} : vector<8x2xf32> to vector<8x1xf32>
    %131 = vector.broadcast %130 : vector<8x1xf32> to vector<8x4xf32>
    %132 = vector.broadcast %2 : vector<1x4xf32> to vector<8x4xf32>
    %133 = arith.mulf %131, %132 : vector<8x4xf32>
    %134 = arith.addf %129, %133 : vector<8x4xf32>
    %135 = vector.extract_strided_slice %126 {offsets = [0, 1], sizes = [8, 1], strides = [1, 1]} : vector<8x2xf32> to vector<8x1xf32>
    %136 = vector.broadcast %135 : vector<8x1xf32> to vector<8x4xf32>
    %137 = vector.broadcast %3 : vector<1x4xf32> to vector<8x4xf32>
    %138 = arith.mulf %136, %137 : vector<8x4xf32>
    %139 = arith.addf %134, %138 : vector<8x4xf32>
    %140 = vector.broadcast %4 : vector<1x4xf32> to vector<8x4xf32>
    %141 = arith.addf %139, %140 : vector<8x4xf32>
    %142 = vector.extract_strided_slice %141 {offsets = [0, 0], sizes = [8, 1], strides = [1, 1]} : vector<8x4xf32> to vector<8x1xf32>
    %143 = vector.broadcast %142 : vector<8x1xf32> to vector<8x2xf32>
    %144 = vector.broadcast %6 : vector<1x2xf32> to vector<8x2xf32>
    %145 = arith.mulf %143, %144 : vector<8x2xf32>
    %146 = vector.extract_strided_slice %141 {offsets = [0, 1], sizes = [8, 1], strides = [1, 1]} : vector<8x4xf32> to vector<8x1xf32>
    %147 = math.tanh %146 : vector<8x1xf32>
    %148 = vector.broadcast %147 : vector<8x1xf32> to vector<8x2xf32>
    %149 = vector.broadcast %7 : vector<1x2xf32> to vector<8x2xf32>
    %150 = arith.mulf %148, %149 : vector<8x2xf32>
    %151 = arith.addf %145, %150 : vector<8x2xf32>
    %152 = vector.extract_strided_slice %141 {offsets = [0, 2], sizes = [8, 1], strides = [1, 1]} : vector<8x4xf32> to vector<8x1xf32>
    %153 = vector.broadcast %152 : vector<8x1xf32> to vector<8x2xf32>
    %154 = vector.broadcast %8 : vector<1x2xf32> to vector<8x2xf32>
    %155 = arith.mulf %153, %154 : vector<8x2xf32>
    %156 = arith.addf %151, %155 : vector<8x2xf32>
    %157 = vector.extract_strided_slice %141 {offsets = [0, 3], sizes = [8, 1], strides = [1, 1]} : vector<8x4xf32> to vector<8x1xf32>
    %158 = math.tanh %157 : vector<8x1xf32>
    %159 = vector.broadcast %158 : vector<8x1xf32> to vector<8x2xf32>
    %160 = vector.broadcast %9 : vector<1x2xf32> to vector<8x2xf32>
    %161 = arith.mulf %159, %160 : vector<8x2xf32>
    %162 = arith.addf %156, %161 : vector<8x2xf32>
    %163 = vector.broadcast %10 : vector<1x2xf32> to vector<8x2xf32>
    %164 = arith.addf %162, %163 : vector<8x2xf32>
    %cst_36 = arith.constant 0.000000e+00 : f32
    %165 = vector.broadcast %cst_36 : f32 to vector<8x2xf32>
    %166 = arith.cmpf ogt, %164, %165 : vector<8x2xf32>
    %cst_37 = arith.constant 1.000000e+00 : f32
    %167 = vector.broadcast %cst_37 : f32 to vector<8x2xf32>
    %168 = arith.addf %164, %167 : vector<8x2xf32>
    %169 = math.exp %164 : vector<8x2xf32>
    %170 = arith.select %166, %168, %169 : vector<8x2xi1>, vector<8x2xf32>
    %cst_38 = arith.constant 1.000000e-15 : f32
    %171 = vector.broadcast %cst_38 : f32 to vector<8x2xf32>
    %172 = arith.addf %170, %171 : vector<8x2xf32>
    %173 = arith.index_cast %c2_i32 : i32 to index
    %c0_39 = arith.constant 0 : index
    %c0_40 = arith.constant 0 : index
    %174 = vector.load %arg7[%173, %c0_39, %c0_40] : memref<8x8x2xf32, #tpu.memory_space<vmem>>, vector<1x8x2xf32>
    %175 = vector.shape_cast %174 : vector<1x8x2xf32> to vector<8x2xf32>
    %176 = vector.shape_cast %172 : vector<8x2xf32> to vector<1x8x2xf32>
    tpu.vector_store %arg7[%173, %c0_39, %c0_40], %176 {strides = array<i32>} : memref<8x8x2xf32, #tpu.memory_space<vmem>>, vector<1x8x2xf32>,
    %c0_41 = arith.constant 0 : index
    %c0_42 = arith.constant 0 : index
    %177 = vector.load %arg8[%c0_41, %c0_42] : memref<8x2xf32, #tpu.memory_space<vmem>>, vector<8x2xf32>
    tpu.vector_store %arg8[%c0_41, %c0_42], %172 {strides = array<i32>} : memref<8x2xf32, #tpu.memory_space<vmem>>, vector<8x2xf32>,
    %c3_i32 = arith.constant 3 : i32
    %178 = arith.index_cast %c3_i32 : i32 to index
    %c0_43 = arith.constant 0 : index
    %c0_44 = arith.constant 0 : index
    %179 = vector.load %arg1[%178, %c0_43, %c0_44] : memref<8x8x1xf32, #tpu.memory_space<vmem>>, vector<1x8x1xf32>
    %180 = vector.shape_cast %179 : vector<1x8x1xf32> to vector<8x1xf32>
    %c0_45 = arith.constant 0 : index
    %c0_46 = arith.constant 0 : index
    %181 = vector.load %arg8[%c0_45, %c0_46] : memref<8x2xf32, #tpu.memory_space<vmem>>, vector<8x2xf32>
    %182 = vector.broadcast %180 : vector<8x1xf32> to vector<8x4xf32>
    %183 = vector.broadcast %1 : vector<1x4xf32> to vector<8x4xf32>
    %184 = arith.mulf %182, %183 : vector<8x4xf32>
    %185 = vector.extract_strided_slice %181 {offsets = [0, 0], sizes = [8, 1], strides = [1, 1]} : vector<8x2xf32> to vector<8x1xf32>
    %186 = vector.broadcast %185 : vector<8x1xf32> to vector<8x4xf32>
    %187 = vector.broadcast %2 : vector<1x4xf32> to vector<8x4xf32>
    %188 = arith.mulf %186, %187 : vector<8x4xf32>
    %189 = arith.addf %184, %188 : vector<8x4xf32>
    %190 = vector.extract_strided_slice %181 {offsets = [0, 1], sizes = [8, 1], strides = [1, 1]} : vector<8x2xf32> to vector<8x1xf32>
    %191 = vector.broadcast %190 : vector<8x1xf32> to vector<8x4xf32>
    %192 = vector.broadcast %3 : vector<1x4xf32> to vector<8x4xf32>
    %193 = arith.mulf %191, %192 : vector<8x4xf32>
    %194 = arith.addf %189, %193 : vector<8x4xf32>
    %195 = vector.broadcast %4 : vector<1x4xf32> to vector<8x4xf32>
    %196 = arith.addf %194, %195 : vector<8x4xf32>
    %197 = vector.extract_strided_slice %196 {offsets = [0, 0], sizes = [8, 1], strides = [1, 1]} : vector<8x4xf32> to vector<8x1xf32>
    %198 = vector.broadcast %197 : vector<8x1xf32> to vector<8x2xf32>
    %199 = vector.broadcast %6 : vector<1x2xf32> to vector<8x2xf32>
    %200 = arith.mulf %198, %199 : vector<8x2xf32>
    %201 = vector.extract_strided_slice %196 {offsets = [0, 1], sizes = [8, 1], strides = [1, 1]} : vector<8x4xf32> to vector<8x1xf32>
    %202 = math.tanh %201 : vector<8x1xf32>
    %203 = vector.broadcast %202 : vector<8x1xf32> to vector<8x2xf32>
    %204 = vector.broadcast %7 : vector<1x2xf32> to vector<8x2xf32>
    %205 = arith.mulf %203, %204 : vector<8x2xf32>
    %206 = arith.addf %200, %205 : vector<8x2xf32>
    %207 = vector.extract_strided_slice %196 {offsets = [0, 2], sizes = [8, 1], strides = [1, 1]} : vector<8x4xf32> to vector<8x1xf32>
    %208 = vector.broadcast %207 : vector<8x1xf32> to vector<8x2xf32>
    %209 = vector.broadcast %8 : vector<1x2xf32> to vector<8x2xf32>
    %210 = arith.mulf %208, %209 : vector<8x2xf32>
    %211 = arith.addf %206, %210 : vector<8x2xf32>
    %212 = vector.extract_strided_slice %196 {offsets = [0, 3], sizes = [8, 1], strides = [1, 1]} : vector<8x4xf32> to vector<8x1xf32>
    %213 = math.tanh %212 : vector<8x1xf32>
    %214 = vector.broadcast %213 : vector<8x1xf32> to vector<8x2xf32>
    %215 = vector.broadcast %9 : vector<1x2xf32> to vector<8x2xf32>
    %216 = arith.mulf %214, %215 : vector<8x2xf32>
    %217 = arith.addf %211, %216 : vector<8x2xf32>
    %218 = vector.broadcast %10 : vector<1x2xf32> to vector<8x2xf32>
    %219 = arith.addf %217, %218 : vector<8x2xf32>
    %cst_47 = arith.constant 0.000000e+00 : f32
    %220 = vector.broadcast %cst_47 : f32 to vector<8x2xf32>
    %221 = arith.cmpf ogt, %219, %220 : vector<8x2xf32>
    %cst_48 = arith.constant 1.000000e+00 : f32
    %222 = vector.broadcast %cst_48 : f32 to vector<8x2xf32>
    %223 = arith.addf %219, %222 : vector<8x2xf32>
    %224 = math.exp %219 : vector<8x2xf32>
    %225 = arith.select %221, %223, %224 : vector<8x2xi1>, vector<8x2xf32>
    %cst_49 = arith.constant 1.000000e-15 : f32
    %226 = vector.broadcast %cst_49 : f32 to vector<8x2xf32>
    %227 = arith.addf %225, %226 : vector<8x2xf32>
    %228 = arith.index_cast %c3_i32 : i32 to index
    %c0_50 = arith.constant 0 : index
    %c0_51 = arith.constant 0 : index
    %229 = vector.load %arg7[%228, %c0_50, %c0_51] : memref<8x8x2xf32, #tpu.memory_space<vmem>>, vector<1x8x2xf32>
    %230 = vector.shape_cast %229 : vector<1x8x2xf32> to vector<8x2xf32>
    %231 = vector.shape_cast %227 : vector<8x2xf32> to vector<1x8x2xf32>
    tpu.vector_store %arg7[%228, %c0_50, %c0_51], %231 {strides = array<i32>} : memref<8x8x2xf32, #tpu.memory_space<vmem>>, vector<1x8x2xf32>,
    %c0_52 = arith.constant 0 : index
    %c0_53 = arith.constant 0 : index
    %232 = vector.load %arg8[%c0_52, %c0_53] : memref<8x2xf32, #tpu.memory_space<vmem>>, vector<8x2xf32>
    tpu.vector_store %arg8[%c0_52, %c0_53], %227 {strides = array<i32>} : memref<8x2xf32, #tpu.memory_space<vmem>>, vector<8x2xf32>,
    %c4_i32 = arith.constant 4 : i32
    %233 = arith.index_cast %c4_i32 : i32 to index
    %c0_54 = arith.constant 0 : index
    %c0_55 = arith.constant 0 : index
    %234 = vector.load %arg1[%233, %c0_54, %c0_55] : memref<8x8x1xf32, #tpu.memory_space<vmem>>, vector<1x8x1xf32>
    %235 = vector.shape_cast %234 : vector<1x8x1xf32> to vector<8x1xf32>
    %c0_56 = arith.constant 0 : index
    %c0_57 = arith.constant 0 : index
    %236 = vector.load %arg8[%c0_56, %c0_57] : memref<8x2xf32, #tpu.memory_space<vmem>>, vector<8x2xf32>
    %237 = vector.broadcast %235 : vector<8x1xf32> to vector<8x4xf32>
    %238 = vector.broadcast %1 : vector<1x4xf32> to vector<8x4xf32>
    %239 = arith.mulf %237, %238 : vector<8x4xf32>
    %240 = vector.extract_strided_slice %236 {offsets = [0, 0], sizes = [8, 1], strides = [1, 1]} : vector<8x2xf32> to vector<8x1xf32>
    %241 = vector.broadcast %240 : vector<8x1xf32> to vector<8x4xf32>
    %242 = vector.broadcast %2 : vector<1x4xf32> to vector<8x4xf32>
    %243 = arith.mulf %241, %242 : vector<8x4xf32>
    %244 = arith.addf %239, %243 : vector<8x4xf32>
    %245 = vector.extract_strided_slice %236 {offsets = [0, 1], sizes = [8, 1], strides = [1, 1]} : vector<8x2xf32> to vector<8x1xf32>
    %246 = vector.broadcast %245 : vector<8x1xf32> to vector<8x4xf32>
    %247 = vector.broadcast %3 : vector<1x4xf32> to vector<8x4xf32>
    %248 = arith.mulf %246, %247 : vector<8x4xf32>
    %249 = arith.addf %244, %248 : vector<8x4xf32>
    %250 = vector.broadcast %4 : vector<1x4xf32> to vector<8x4xf32>
    %251 = arith.addf %249, %250 : vector<8x4xf32>
    %252 = vector.extract_strided_slice %251 {offsets = [0, 0], sizes = [8, 1], strides = [1, 1]} : vector<8x4xf32> to vector<8x1xf32>
    %253 = vector.broadcast %252 : vector<8x1xf32> to vector<8x2xf32>
    %254 = vector.broadcast %6 : vector<1x2xf32> to vector<8x2xf32>
    %255 = arith.mulf %253, %254 : vector<8x2xf32>
    %256 = vector.extract_strided_slice %251 {offsets = [0, 1], sizes = [8, 1], strides = [1, 1]} : vector<8x4xf32> to vector<8x1xf32>
    %257 = math.tanh %256 : vector<8x1xf32>
    %258 = vector.broadcast %257 : vector<8x1xf32> to vector<8x2xf32>
    %259 = vector.broadcast %7 : vector<1x2xf32> to vector<8x2xf32>
    %260 = arith.mulf %258, %259 : vector<8x2xf32>
    %261 = arith.addf %255, %260 : vector<8x2xf32>
    %262 = vector.extract_strided_slice %251 {offsets = [0, 2], sizes = [8, 1], strides = [1, 1]} : vector<8x4xf32> to vector<8x1xf32>
    %263 = vector.broadcast %262 : vector<8x1xf32> to vector<8x2xf32>
    %264 = vector.broadcast %8 : vector<1x2xf32> to vector<8x2xf32>
    %265 = arith.mulf %263, %264 : vector<8x2xf32>
    %266 = arith.addf %261, %265 : vector<8x2xf32>
    %267 = vector.extract_strided_slice %251 {offsets = [0, 3], sizes = [8, 1], strides = [1, 1]} : vector<8x4xf32> to vector<8x1xf32>
    %268 = math.tanh %267 : vector<8x1xf32>
    %269 = vector.broadcast %268 : vector<8x1xf32> to vector<8x2xf32>
    %270 = vector.broadcast %9 : vector<1x2xf32> to vector<8x2xf32>
    %271 = arith.mulf %269, %270 : vector<8x2xf32>
    %272 = arith.addf %266, %271 : vector<8x2xf32>
    %273 = vector.broadcast %10 : vector<1x2xf32> to vector<8x2xf32>
    %274 = arith.addf %272, %273 : vector<8x2xf32>
    %cst_58 = arith.constant 0.000000e+00 : f32
    %275 = vector.broadcast %cst_58 : f32 to vector<8x2xf32>
    %276 = arith.cmpf ogt, %274, %275 : vector<8x2xf32>
    %cst_59 = arith.constant 1.000000e+00 : f32
    %277 = vector.broadcast %cst_59 : f32 to vector<8x2xf32>
    %278 = arith.addf %274, %277 : vector<8x2xf32>
    %279 = math.exp %274 : vector<8x2xf32>
    %280 = arith.select %276, %278, %279 : vector<8x2xi1>, vector<8x2xf32>
    %cst_60 = arith.constant 1.000000e-15 : f32
    %281 = vector.broadcast %cst_60 : f32 to vector<8x2xf32>
    %282 = arith.addf %280, %281 : vector<8x2xf32>
    %283 = arith.index_cast %c4_i32 : i32 to index
    %c0_61 = arith.constant 0 : index
    %c0_62 = arith.constant 0 : index
    %284 = vector.load %arg7[%283, %c0_61, %c0_62] : memref<8x8x2xf32, #tpu.memory_space<vmem>>, vector<1x8x2xf32>
    %285 = vector.shape_cast %284 : vector<1x8x2xf32> to vector<8x2xf32>
    %286 = vector.shape_cast %282 : vector<8x2xf32> to vector<1x8x2xf32>
    tpu.vector_store %arg7[%283, %c0_61, %c0_62], %286 {strides = array<i32>} : memref<8x8x2xf32, #tpu.memory_space<vmem>>, vector<1x8x2xf32>,
    %c0_63 = arith.constant 0 : index
    %c0_64 = arith.constant 0 : index
    %287 = vector.load %arg8[%c0_63, %c0_64] : memref<8x2xf32, #tpu.memory_space<vmem>>, vector<8x2xf32>
    tpu.vector_store %arg8[%c0_63, %c0_64], %282 {strides = array<i32>} : memref<8x2xf32, #tpu.memory_space<vmem>>, vector<8x2xf32>,
    %c5_i32 = arith.constant 5 : i32
    %288 = arith.index_cast %c5_i32 : i32 to index
    %c0_65 = arith.constant 0 : index
    %c0_66 = arith.constant 0 : index
    %289 = vector.load %arg1[%288, %c0_65, %c0_66] : memref<8x8x1xf32, #tpu.memory_space<vmem>>, vector<1x8x1xf32>
    %290 = vector.shape_cast %289 : vector<1x8x1xf32> to vector<8x1xf32>
    %c0_67 = arith.constant 0 : index
    %c0_68 = arith.constant 0 : index
    %291 = vector.load %arg8[%c0_67, %c0_68] : memref<8x2xf32, #tpu.memory_space<vmem>>, vector<8x2xf32>
    %292 = vector.broadcast %290 : vector<8x1xf32> to vector<8x4xf32>
    %293 = vector.broadcast %1 : vector<1x4xf32> to vector<8x4xf32>
    %294 = arith.mulf %292, %293 : vector<8x4xf32>
    %295 = vector.extract_strided_slice %291 {offsets = [0, 0], sizes = [8, 1], strides = [1, 1]} : vector<8x2xf32> to vector<8x1xf32>
    %296 = vector.broadcast %295 : vector<8x1xf32> to vector<8x4xf32>
    %297 = vector.broadcast %2 : vector<1x4xf32> to vector<8x4xf32>
    %298 = arith.mulf %296, %297 : vector<8x4xf32>
    %299 = arith.addf %294, %298 : vector<8x4xf32>
    %300 = vector.extract_strided_slice %291 {offsets = [0, 1], sizes = [8, 1], strides = [1, 1]} : vector<8x2xf32> to vector<8x1xf32>
    %301 = vector.broadcast %300 : vector<8x1xf32> to vector<8x4xf32>
    %302 = vector.broadcast %3 : vector<1x4xf32> to vector<8x4xf32>
    %303 = arith.mulf %301, %302 : vector<8x4xf32>
    %304 = arith.addf %299, %303 : vector<8x4xf32>
    %305 = vector.broadcast %4 : vector<1x4xf32> to vector<8x4xf32>
    %306 = arith.addf %304, %305 : vector<8x4xf32>
    %307 = vector.extract_strided_slice %306 {offsets = [0, 0], sizes = [8, 1], strides = [1, 1]} : vector<8x4xf32> to vector<8x1xf32>
    %308 = vector.broadcast %307 : vector<8x1xf32> to vector<8x2xf32>
    %309 = vector.broadcast %6 : vector<1x2xf32> to vector<8x2xf32>
    %310 = arith.mulf %308, %309 : vector<8x2xf32>
    %311 = vector.extract_strided_slice %306 {offsets = [0, 1], sizes = [8, 1], strides = [1, 1]} : vector<8x4xf32> to vector<8x1xf32>
    %312 = math.tanh %311 : vector<8x1xf32>
    %313 = vector.broadcast %312 : vector<8x1xf32> to vector<8x2xf32>
    %314 = vector.broadcast %7 : vector<1x2xf32> to vector<8x2xf32>
    %315 = arith.mulf %313, %314 : vector<8x2xf32>
    %316 = arith.addf %310, %315 : vector<8x2xf32>
    %317 = vector.extract_strided_slice %306 {offsets = [0, 2], sizes = [8, 1], strides = [1, 1]} : vector<8x4xf32> to vector<8x1xf32>
    %318 = vector.broadcast %317 : vector<8x1xf32> to vector<8x2xf32>
    %319 = vector.broadcast %8 : vector<1x2xf32> to vector<8x2xf32>
    %320 = arith.mulf %318, %319 : vector<8x2xf32>
    %321 = arith.addf %316, %320 : vector<8x2xf32>
    %322 = vector.extract_strided_slice %306 {offsets = [0, 3], sizes = [8, 1], strides = [1, 1]} : vector<8x4xf32> to vector<8x1xf32>
    %323 = math.tanh %322 : vector<8x1xf32>
    %324 = vector.broadcast %323 : vector<8x1xf32> to vector<8x2xf32>
    %325 = vector.broadcast %9 : vector<1x2xf32> to vector<8x2xf32>
    %326 = arith.mulf %324, %325 : vector<8x2xf32>
    %327 = arith.addf %321, %326 : vector<8x2xf32>
    %328 = vector.broadcast %10 : vector<1x2xf32> to vector<8x2xf32>
    %329 = arith.addf %327, %328 : vector<8x2xf32>
    %cst_69 = arith.constant 0.000000e+00 : f32
    %330 = vector.broadcast %cst_69 : f32 to vector<8x2xf32>
    %331 = arith.cmpf ogt, %329, %330 : vector<8x2xf32>
    %cst_70 = arith.constant 1.000000e+00 : f32
    %332 = vector.broadcast %cst_70 : f32 to vector<8x2xf32>
    %333 = arith.addf %329, %332 : vector<8x2xf32>
    %334 = math.exp %329 : vector<8x2xf32>
    %335 = arith.select %331, %333, %334 : vector<8x2xi1>, vector<8x2xf32>
    %cst_71 = arith.constant 1.000000e-15 : f32
    %336 = vector.broadcast %cst_71 : f32 to vector<8x2xf32>
    %337 = arith.addf %335, %336 : vector<8x2xf32>
    %338 = arith.index_cast %c5_i32 : i32 to index
    %c0_72 = arith.constant 0 : index
    %c0_73 = arith.constant 0 : index
    %339 = vector.load %arg7[%338, %c0_72, %c0_73] : memref<8x8x2xf32, #tpu.memory_space<vmem>>, vector<1x8x2xf32>
    %340 = vector.shape_cast %339 : vector<1x8x2xf32> to vector<8x2xf32>
    %341 = vector.shape_cast %337 : vector<8x2xf32> to vector<1x8x2xf32>
    tpu.vector_store %arg7[%338, %c0_72, %c0_73], %341 {strides = array<i32>} : memref<8x8x2xf32, #tpu.memory_space<vmem>>, vector<1x8x2xf32>,
    %c0_74 = arith.constant 0 : index
    %c0_75 = arith.constant 0 : index
    %342 = vector.load %arg8[%c0_74, %c0_75] : memref<8x2xf32, #tpu.memory_space<vmem>>, vector<8x2xf32>
    tpu.vector_store %arg8[%c0_74, %c0_75], %337 {strides = array<i32>} : memref<8x2xf32, #tpu.memory_space<vmem>>, vector<8x2xf32>,
    %c6_i32 = arith.constant 6 : i32
    %343 = arith.index_cast %c6_i32 : i32 to index
    %c0_76 = arith.constant 0 : index
    %c0_77 = arith.constant 0 : index
    %344 = vector.load %arg1[%343, %c0_76, %c0_77] : memref<8x8x1xf32, #tpu.memory_space<vmem>>, vector<1x8x1xf32>
    %345 = vector.shape_cast %344 : vector<1x8x1xf32> to vector<8x1xf32>
    %c0_78 = arith.constant 0 : index
    %c0_79 = arith.constant 0 : index
    %346 = vector.load %arg8[%c0_78, %c0_79] : memref<8x2xf32, #tpu.memory_space<vmem>>, vector<8x2xf32>
    %347 = vector.broadcast %345 : vector<8x1xf32> to vector<8x4xf32>
    %348 = vector.broadcast %1 : vector<1x4xf32> to vector<8x4xf32>
    %349 = arith.mulf %347, %348 : vector<8x4xf32>
    %350 = vector.extract_strided_slice %346 {offsets = [0, 0], sizes = [8, 1], strides = [1, 1]} : vector<8x2xf32> to vector<8x1xf32>
    %351 = vector.broadcast %350 : vector<8x1xf32> to vector<8x4xf32>
    %352 = vector.broadcast %2 : vector<1x4xf32> to vector<8x4xf32>
    %353 = arith.mulf %351, %352 : vector<8x4xf32>
    %354 = arith.addf %349, %353 : vector<8x4xf32>
    %355 = vector.extract_strided_slice %346 {offsets = [0, 1], sizes = [8, 1], strides = [1, 1]} : vector<8x2xf32> to vector<8x1xf32>
    %356 = vector.broadcast %355 : vector<8x1xf32> to vector<8x4xf32>
    %357 = vector.broadcast %3 : vector<1x4xf32> to vector<8x4xf32>
    %358 = arith.mulf %356, %357 : vector<8x4xf32>
    %359 = arith.addf %354, %358 : vector<8x4xf32>
    %360 = vector.broadcast %4 : vector<1x4xf32> to vector<8x4xf32>
    %361 = arith.addf %359, %360 : vector<8x4xf32>
    %362 = vector.extract_strided_slice %361 {offsets = [0, 0], sizes = [8, 1], strides = [1, 1]} : vector<8x4xf32> to vector<8x1xf32>
    %363 = vector.broadcast %362 : vector<8x1xf32> to vector<8x2xf32>
    %364 = vector.broadcast %6 : vector<1x2xf32> to vector<8x2xf32>
    %365 = arith.mulf %363, %364 : vector<8x2xf32>
    %366 = vector.extract_strided_slice %361 {offsets = [0, 1], sizes = [8, 1], strides = [1, 1]} : vector<8x4xf32> to vector<8x1xf32>
    %367 = math.tanh %366 : vector<8x1xf32>
    %368 = vector.broadcast %367 : vector<8x1xf32> to vector<8x2xf32>
    %369 = vector.broadcast %7 : vector<1x2xf32> to vector<8x2xf32>
    %370 = arith.mulf %368, %369 : vector<8x2xf32>
    %371 = arith.addf %365, %370 : vector<8x2xf32>
    %372 = vector.extract_strided_slice %361 {offsets = [0, 2], sizes = [8, 1], strides = [1, 1]} : vector<8x4xf32> to vector<8x1xf32>
    %373 = vector.broadcast %372 : vector<8x1xf32> to vector<8x2xf32>
    %374 = vector.broadcast %8 : vector<1x2xf32> to vector<8x2xf32>
    %375 = arith.mulf %373, %374 : vector<8x2xf32>
    %376 = arith.addf %371, %375 : vector<8x2xf32>
    %377 = vector.extract_strided_slice %361 {offsets = [0, 3], sizes = [8, 1], strides = [1, 1]} : vector<8x4xf32> to vector<8x1xf32>
    %378 = math.tanh %377 : vector<8x1xf32>
    %379 = vector.broadcast %378 : vector<8x1xf32> to vector<8x2xf32>
    %380 = vector.broadcast %9 : vector<1x2xf32> to vector<8x2xf32>
    %381 = arith.mulf %379, %380 : vector<8x2xf32>
    %382 = arith.addf %376, %381 : vector<8x2xf32>
    %383 = vector.broadcast %10 : vector<1x2xf32> to vector<8x2xf32>
    %384 = arith.addf %382, %383 : vector<8x2xf32>
    %cst_80 = arith.constant 0.000000e+00 : f32
    %385 = vector.broadcast %cst_80 : f32 to vector<8x2xf32>
    %386 = arith.cmpf ogt, %384, %385 : vector<8x2xf32>
    %cst_81 = arith.constant 1.000000e+00 : f32
    %387 = vector.broadcast %cst_81 : f32 to vector<8x2xf32>
    %388 = arith.addf %384, %387 : vector<8x2xf32>
    %389 = math.exp %384 : vector<8x2xf32>
    %390 = arith.select %386, %388, %389 : vector<8x2xi1>, vector<8x2xf32>
    %cst_82 = arith.constant 1.000000e-15 : f32
    %391 = vector.broadcast %cst_82 : f32 to vector<8x2xf32>
    %392 = arith.addf %390, %391 : vector<8x2xf32>
    %393 = arith.index_cast %c6_i32 : i32 to index
    %c0_83 = arith.constant 0 : index
    %c0_84 = arith.constant 0 : index
    %394 = vector.load %arg7[%393, %c0_83, %c0_84] : memref<8x8x2xf32, #tpu.memory_space<vmem>>, vector<1x8x2xf32>
    %395 = vector.shape_cast %394 : vector<1x8x2xf32> to vector<8x2xf32>
    %396 = vector.shape_cast %392 : vector<8x2xf32> to vector<1x8x2xf32>
    tpu.vector_store %arg7[%393, %c0_83, %c0_84], %396 {strides = array<i32>} : memref<8x8x2xf32, #tpu.memory_space<vmem>>, vector<1x8x2xf32>,
    %c0_85 = arith.constant 0 : index
    %c0_86 = arith.constant 0 : index
    %397 = vector.load %arg8[%c0_85, %c0_86] : memref<8x2xf32, #tpu.memory_space<vmem>>, vector<8x2xf32>
    tpu.vector_store %arg8[%c0_85, %c0_86], %392 {strides = array<i32>} : memref<8x2xf32, #tpu.memory_space<vmem>>, vector<8x2xf32>,
    %c7_i32 = arith.constant 7 : i32
    %398 = arith.index_cast %c7_i32 : i32 to index
    %c0_87 = arith.constant 0 : index
    %c0_88 = arith.constant 0 : index
    %399 = vector.load %arg1[%398, %c0_87, %c0_88] : memref<8x8x1xf32, #tpu.memory_space<vmem>>, vector<1x8x1xf32>
    %400 = vector.shape_cast %399 : vector<1x8x1xf32> to vector<8x1xf32>
    %c0_89 = arith.constant 0 : index
    %c0_90 = arith.constant 0 : index
    %401 = vector.load %arg8[%c0_89, %c0_90] : memref<8x2xf32, #tpu.memory_space<vmem>>, vector<8x2xf32>
    %402 = vector.broadcast %400 : vector<8x1xf32> to vector<8x4xf32>
    %403 = vector.broadcast %1 : vector<1x4xf32> to vector<8x4xf32>
    %404 = arith.mulf %402, %403 : vector<8x4xf32>
    %405 = vector.extract_strided_slice %401 {offsets = [0, 0], sizes = [8, 1], strides = [1, 1]} : vector<8x2xf32> to vector<8x1xf32>
    %406 = vector.broadcast %405 : vector<8x1xf32> to vector<8x4xf32>
    %407 = vector.broadcast %2 : vector<1x4xf32> to vector<8x4xf32>
    %408 = arith.mulf %406, %407 : vector<8x4xf32>
    %409 = arith.addf %404, %408 : vector<8x4xf32>
    %410 = vector.extract_strided_slice %401 {offsets = [0, 1], sizes = [8, 1], strides = [1, 1]} : vector<8x2xf32> to vector<8x1xf32>
    %411 = vector.broadcast %410 : vector<8x1xf32> to vector<8x4xf32>
    %412 = vector.broadcast %3 : vector<1x4xf32> to vector<8x4xf32>
    %413 = arith.mulf %411, %412 : vector<8x4xf32>
    %414 = arith.addf %409, %413 : vector<8x4xf32>
    %415 = vector.broadcast %4 : vector<1x4xf32> to vector<8x4xf32>
    %416 = arith.addf %414, %415 : vector<8x4xf32>
    %417 = vector.extract_strided_slice %416 {offsets = [0, 0], sizes = [8, 1], strides = [1, 1]} : vector<8x4xf32> to vector<8x1xf32>
    %418 = vector.broadcast %417 : vector<8x1xf32> to vector<8x2xf32>
    %419 = vector.broadcast %6 : vector<1x2xf32> to vector<8x2xf32>
    %420 = arith.mulf %418, %419 : vector<8x2xf32>
    %421 = vector.extract_strided_slice %416 {offsets = [0, 1], sizes = [8, 1], strides = [1, 1]} : vector<8x4xf32> to vector<8x1xf32>
    %422 = math.tanh %421 : vector<8x1xf32>
    %423 = vector.broadcast %422 : vector<8x1xf32> to vector<8x2xf32>
    %424 = vector.broadcast %7 : vector<1x2xf32> to vector<8x2xf32>
    %425 = arith.mulf %423, %424 : vector<8x2xf32>
    %426 = arith.addf %420, %425 : vector<8x2xf32>
    %427 = vector.extract_strided_slice %416 {offsets = [0, 2], sizes = [8, 1], strides = [1, 1]} : vector<8x4xf32> to vector<8x1xf32>
    %428 = vector.broadcast %427 : vector<8x1xf32> to vector<8x2xf32>
    %429 = vector.broadcast %8 : vector<1x2xf32> to vector<8x2xf32>
    %430 = arith.mulf %428, %429 : vector<8x2xf32>
    %431 = arith.addf %426, %430 : vector<8x2xf32>
    %432 = vector.extract_strided_slice %416 {offsets = [0, 3], sizes = [8, 1], strides = [1, 1]} : vector<8x4xf32> to vector<8x1xf32>
    %433 = math.tanh %432 : vector<8x1xf32>
    %434 = vector.broadcast %433 : vector<8x1xf32> to vector<8x2xf32>
    %435 = vector.broadcast %9 : vector<1x2xf32> to vector<8x2xf32>
    %436 = arith.mulf %434, %435 : vector<8x2xf32>
    %437 = arith.addf %431, %436 : vector<8x2xf32>
    %438 = vector.broadcast %10 : vector<1x2xf32> to vector<8x2xf32>
    %439 = arith.addf %437, %438 : vector<8x2xf32>
    %cst_91 = arith.constant 0.000000e+00 : f32
    %440 = vector.broadcast %cst_91 : f32 to vector<8x2xf32>
    %441 = arith.cmpf ogt, %439, %440 : vector<8x2xf32>
    %cst_92 = arith.constant 1.000000e+00 : f32
    %442 = vector.broadcast %cst_92 : f32 to vector<8x2xf32>
    %443 = arith.addf %439, %442 : vector<8x2xf32>
    %444 = math.exp %439 : vector<8x2xf32>
    %445 = arith.select %441, %443, %444 : vector<8x2xi1>, vector<8x2xf32>
    %cst_93 = arith.constant 1.000000e-15 : f32
    %446 = vector.broadcast %cst_93 : f32 to vector<8x2xf32>
    %447 = arith.addf %445, %446 : vector<8x2xf32>
    %448 = arith.index_cast %c7_i32 : i32 to index
    %c0_94 = arith.constant 0 : index
    %c0_95 = arith.constant 0 : index
    %449 = vector.load %arg7[%448, %c0_94, %c0_95] : memref<8x8x2xf32, #tpu.memory_space<vmem>>, vector<1x8x2xf32>
    %450 = vector.shape_cast %449 : vector<1x8x2xf32> to vector<8x2xf32>
    %451 = vector.shape_cast %447 : vector<8x2xf32> to vector<1x8x2xf32>
    tpu.vector_store %arg7[%448, %c0_94, %c0_95], %451 {strides = array<i32>} : memref<8x8x2xf32, #tpu.memory_space<vmem>>, vector<1x8x2xf32>,
    %c0_96 = arith.constant 0 : index
    %c0_97 = arith.constant 0 : index
    %452 = vector.load %arg8[%c0_96, %c0_97] : memref<8x2xf32, #tpu.memory_space<vmem>>, vector<8x2xf32>
    tpu.vector_store %arg8[%c0_96, %c0_97], %447 {strides = array<i32>} : memref<8x2xf32, #tpu.memory_space<vmem>>, vector<8x2xf32>,
    %c8_i32 = arith.constant 8 : i32
    return
  }
  func.func @transform_0(%arg0: i32) -> (i32, i32, i32) {
    %c0_i32 = arith.constant 0 : i32
    %c0_i32_0 = arith.constant 0 : i32
    %c0_i32_1 = arith.constant 0 : i32
    return %c0_i32, %arg0, %c0_i32_0 : i32, i32, i32
  }
  func.func @transform_1(%arg0: i32) -> (i32, i32) {
    %c0_i32 = arith.constant 0 : i32
    %c0_i32_0 = arith.constant 0 : i32
    return %arg0, %c0_i32 : i32, i32
  }
  func.func @transform_2(%arg0: i32) -> (i32, i32) {
    %c0_i32 = arith.constant 0 : i32
    %c0_i32_0 = arith.constant 0 : i32
    %c0_i32_1 = arith.constant 0 : i32
    return %c0_i32, %c0_i32_0 : i32, i32
  }
  func.func @transform_3(%arg0: i32) -> (i32, i32) {
    %c0_i32 = arith.constant 0 : i32
    %c0_i32_0 = arith.constant 0 : i32
    %c0_i32_1 = arith.constant 0 : i32
    return %c0_i32, %c0_i32_0 : i32, i32
  }
  func.func @transform_4(%arg0: i32) -> (i32, i32) {
    %c0_i32 = arith.constant 0 : i32
    %c0_i32_0 = arith.constant 0 : i32
    %c0_i32_1 = arith.constant 0 : i32
    return %c0_i32, %c0_i32_0 : i32, i32
  }
  func.func @transform_5(%arg0: i32) -> (i32, i32) {
    %c0_i32 = arith.constant 0 : i32
    %c0_i32_0 = arith.constant 0 : i32
    %c0_i32_1 = arith.constant 0 : i32
    return %c0_i32, %c0_i32_0 : i32, i32
  }
  func.func @transform_6(%arg0: i32) -> (i32, i32, i32) {
    %c0_i32 = arith.constant 0 : i32
    %c0_i32_0 = arith.constant 0 : i32
    %c0_i32_1 = arith.constant 0 : i32
    return %c0_i32, %arg0, %c0_i32_0 : i32, i32, i32
  }
}

</mosaic_0001>

<bundles_post_ra>
// kernel: tpu_custom_call.1
= control target key start
LH: loop header
LB: loop body
LE: loop exit
PB: predicated region body
PF: predicated region fallthrough
CT: control target
= control target key end

     0   :  { %vm28_vm0 = vcmask 15360   ;;  %v615_v0 = vmov 0   ;;  %v616_v3 = vmov 1   ;;  %v617_v5 = vmov 3   ;;  %s870_s0 = inlined_call_operand.vmem [shape: f32[8,8,1], index: 0, kind: input, shape index: {}]   ;;  %s871_s1 = inlined_call_operand.vmem [shape: f32[8,2], index: 1, kind: input, shape index: {}]   ;;  %s872_s3 = inlined_call_operand.vmem [shape: f32[1,4], index: 3, kind: input, shape index: {}]   ;;  %s873_s2 = inlined_call_operand.vmem [shape: f32[3,4], index: 2, kind: input, shape index: {}]   ;;  %s874_s5 = inlined_call_operand.vmem [shape: f32[1,2], index: 5, kind: input, shape index: {}]   ;;  %s875_s4 = inlined_call_operand.vmem [shape: f32[4,2], index: 4, kind: input, shape index: {}]   ;;  %s876_s6 = inlined_call_operand.vmem [shape: f32[8,8,2], index: 6, kind: output, shape index: {}]  }
   0x1   :  { %535 = vset.pattern.permute.xlu0 %v615_v0  ;;  %v30_v1 = vld [vmem:[%s870_s0] sm:$0xff]  ;;  %536 = vset.pattern.permute.xlu1 %v616_v3  ;;  %v517_v20 = vld [vmem:[%s870_s0 + $0x8] sm:$0xff]  ;;  %v618_v22 = vmov 2   ;;  %v519_v57 = vld [vmem:[%s870_s0 + $0x10] sm:$0xff] }
   0x2   :  { %v27_v2 = vld [vmem:[%s871_s1] sm:$0xff]  ;;  %34 = vperm.xlu0 %535, %v30_v1   ;;  %538 = vset.pattern.permute.xlu2 %v616_v3 }
   0x3   :  { %29 = vst.msk [vmem:[#allocation2] sm:$0xff] %vm28_vm0, %v27_v2  ;;  %v23_v7 = vld [vmem:[%s873_s2] sm:$0x7] }
   0x4   :  { %v669_v8 = vperm.slane %v23_v7, 0  ;;  %v671_v9 = vperm.slane %v23_v7, 1  ;;  %v673_v10 = vperm.slane %v23_v7, 2  ;;  %v681_v17 = vld [vmem:[%s872_s3] ss:$0 sm:$0xff] }
   0x5   :  { %v25_v24 = vld [vmem:[%s875_s4] sm:$0xf] }
   0x6   :  { %v694_v25 = vperm.slane %v25_v24, 0  ;;  %v696_v26 = vperm.slane %v25_v24, 1  ;;  %v700_v30 = vperm.slane %v25_v24, 2  ;;  %v702_v33 = vperm.slane %v25_v24, 3  ;;  %v708_v36 = vld [vmem:[%s874_s5] ss:$0 sm:$0xff] }
   0xa   :  { %v31_v4 = vld [vmem:[#allocation2] sm:$0xff] }
   0xb   :  { %41 = vperm.xlu0 %535, %v31_v4   ;;  %48 = vperm.xlu1 %536, %v31_v4  }
  0x13   :  { %537 = vset.pattern.permute.xlu1 %v615_v0  ;;  %540 = vset.pattern.permute.xlu0 %v617_v5 }
  0x74   :  { %v35_v6 = vpop.permute.xlu0 %34 }
  0x75   :  { %v38_v13 = vmul.f32 %v669_v8, %v35_v6 }
  0x7d   :  { %v42_v11 = vpop.permute.xlu0 %41  ;;  %v49_v12 = vpop.permute.xlu1 %48 }
  0x7e   :  { %v45_v14 = vmul.f32 %v671_v9, %v42_v11  ;;  %v52_v15 = vmul.f32 %v673_v10, %v49_v12 }
  0x80   :  { %v46_v16 = vadd.f32 %v45_v14, %v38_v13 }
  0x82   :  { %v53_v18 = vadd.f32 %v52_v15, %v46_v16 }
  0x84   :  { %v57_v19 = vadd.f32 %v681_v17, %v53_v18 }
  0x86   :  { %60 = vperm.xlu1 %537, %v57_v19   ;;  %583 = vtanh.f32 %v57_v19 }
  0x8c   :  { %v584_v21 = vpop.eup %583 }
  0x8d   :  { %82 = vperm.xlu0 %540, %v584_v21   ;;  %68 = vperm.xlu2 %538, %v584_v21  }
  0x8e   :  { %105 = vperm.xlu1 %537, %v517_v20  }
  0x95   :  { %539 = vset.pattern.permute.xlu2 %v618_v22  ;;  %543 = vset.pattern.permute.xlu0 %v616_v3 }
  0x96   :  { %75 = vperm.xlu2 %539, %v57_v19   ;;  %542 = vset.pattern.permute.xlu1 %v616_v3 }
  0x9e   :  { %541 = vset.pattern.permute.xlu2 %v615_v0 }
  0xe7   :  { %v69_v23 = vpop.permute.xlu2 %68 }
  0xe8   :  { %v72_v29 = vmul.f32 %v696_v26, %v69_v23 }
  0xf0   :  { %v76_v31 = vpop.permute.xlu2 %75 }
  0xf1   :  { %v79_v34 = vmul.f32 %v700_v30, %v76_v31 }
  0xf8   :  { %v61_v27 = vpop.permute.xlu1 %60 }
  0xf9   :  { %v64_v28 = vmul.f32 %v694_v25, %v61_v27 }
  0xfb   :  { %v73_v32 = vadd.f32 %v72_v29, %v64_v28 }
  0xfd   :  { %v80_v37 = vadd.f32 %v79_v34, %v73_v32  ;;  %v521_v34 = vld [vmem:[%s870_s0 + $0x18] sm:$0xff] }
  0xff   :  { %v83_v35 = vpop.permute.xlu0 %82 }
 0x100   :  { %v86_v38 = vmul.f32 %v702_v33, %v83_v35  ;;  %v106_v47 = vpop.permute.xlu1 %105 }
 0x101   :  { %v108_v50 = vmul.f32 %v106_v47, %v669_v8 }
 0x102   :  { %v87_v39 = vadd.f32 %v86_v38, %v80_v37 }
 0x104   :  { %v91_v40 = vadd.f32 %v708_v36, %v87_v39 }
 0x106   :  { %v94_v41 = vmul.f32 1.442695, %v91_v40  ;;  %v93_v42 = vadd.f32 1.0, %v91_v40  ;;  %vm92_vm1 = vcmp.gt.f32.partialorder %v91_v40, 0.0 }
 0x108   :  { %585 = vpow2.f32 %v94_v41 }
 0x10e   :  { %v586_v43 = vpop.eup %585 }
 0x10f   :  { %v96_v44 = vsel %vm92_vm1, %v93_v42, %v586_v43 }
 0x110   :  { %v97_v45 = vadd.f32 1e-15, %v96_v44 }
 0x112   :  { %98 = vst.msk [vmem:[%s876_s6] sm:$0xff] %vm28_vm0, %v97_v45 }
 0x113   :  { %99 = vst.msk [vmem:[#allocation2] sm:$0xff] %vm28_vm0, %v97_v45 }
 0x11a   :  { %v102_v46 = vld [vmem:[#allocation2] sm:$0xff] }
 0x11b   :  { %117 = vperm.xlu1 %542, %v102_v46   ;;  %111 = vperm.xlu2 %541, %v102_v46  }
 0x123   :  { %544 = vset.pattern.permute.xlu1 %v618_v22 }
 0x175   :  { %v112_v48 = vpop.permute.xlu2 %111 }
 0x176   :  { %v114_v49 = vmul.f32 %v112_v48, %v671_v9 }
 0x178   :  { %v115_v52 = vadd.f32 %v114_v49, %v108_v50 }
 0x18d   :  { %v118_v51 = vpop.permute.xlu1 %117 }
 0x18e   :  { %v120_v53 = vmul.f32 %v118_v51, %v673_v10 }
 0x190   :  { %v121_v54 = vadd.f32 %v120_v53, %v115_v52 }
 0x192   :  { %v122_v55 = vadd.f32 %v681_v17, %v121_v54 }
 0x194   :  { %138 = vperm.xlu1 %544, %v122_v55   ;;  %587 = vtanh.f32 %v122_v55  ;;  %125 = vperm.xlu2 %541, %v122_v55  }
 0x19a   :  { %v588_v56 = vpop.eup %587 }
 0x19b   :  { %132 = vperm.xlu0 %543, %v588_v56  }
 0x19c   :  { %545 = vset.pattern.permute.xlu2 %v617_v5  ;;  %546 = vset.pattern.permute.xlu1 %v615_v0 }
 0x19d   :  { %144 = vperm.xlu2 %545, %v588_v56   ;;  %164 = vperm.xlu1 %546, %v519_v57  }
 0x1a5   :  { %547 = vset.pattern.permute.xlu2 %v615_v0 }
 0x1ee   :  { %v126_v58 = vpop.permute.xlu2 %125 }
 0x1ef   :  { %v128_v61 = vmul.f32 %v126_v58, %v694_v25 }
 0x1f7   :  { %v145_v63 = vpop.permute.xlu2 %144 }
 0x1f8   :  { %v147_v4 = vmul.f32 %v145_v63, %v702_v33 }
 0x206   :  { %v139_v59 = vpop.permute.xlu1 %138 }
 0x207   :  { %v141_v1 = vmul.f32 %v139_v59, %v700_v30 }
 0x20d   :  { %v133_v60 = vpop.permute.xlu0 %132 }
 0x20e   :  { %v135_v62 = vmul.f32 %v133_v60, %v696_v26 }
 0x20f   :  { %v165_v19 = vpop.permute.xlu1 %164 }
 0x210   :  { %v136_v2 = vadd.f32 %v135_v62, %v128_v61  ;;  %v167_v21 = vmul.f32 %v165_v19, %v669_v8 }
 0x212   :  { %v142_v6 = vadd.f32 %v141_v1, %v136_v2 }
 0x214   :  { %v148_v7 = vadd.f32 %v147_v4, %v142_v6 }
 0x216   :  { %v149_v11 = vadd.f32 %v708_v36, %v148_v7 }
 0x218   :  { %v152_v12 = vmul.f32 1.442695, %v149_v11  ;;  %v151_v13 = vadd.f32 1.0, %v149_v11  ;;  %vm150_vm2 = vcmp.gt.f32.partialorder %v149_v11, 0.0  ;;  %v523_v11 = vld [vmem:[%s870_s0 + $0x20] sm:$0xff] }
 0x21a   :  { %589 = vpow2.f32 %v152_v12 }
 0x220   :  { %v590_v14 = vpop.eup %589 }
 0x221   :  { %v154_v15 = vsel %vm150_vm2, %v151_v13, %v590_v14 }
 0x222   :  { %v155_v16 = vadd.f32 1e-15, %v154_v15 }
 0x224   :  { %518 = vst.msk [vmem:[%s876_s6 + $0x8] sm:$0xff] %vm28_vm0, %v155_v16 }
 0x225   :  { %158 = vst.msk [vmem:[#allocation2] sm:$0xff] %vm28_vm0, %v155_v16 }
 0x22c   :  { %v161_v18 = vld [vmem:[#allocation2] sm:$0xff] }
 0x22d   :  { %176 = vperm.xlu0 %543, %v161_v18   ;;  %170 = vperm.xlu2 %547, %v161_v18  }
 0x235   :  { %549 = vset.pattern.permute.xlu0 %v618_v22  ;;  %548 = vset.pattern.permute.xlu2 %v616_v3 }
 0x287   :  { %v171_v20 = vpop.permute.xlu2 %170 }
 0x288   :  { %v173_v23 = vmul.f32 %v171_v20, %v671_v9 }
 0x28a   :  { %v174_v27 = vadd.f32 %v173_v23, %v167_v21 }
 0x29f   :  { %v177_v24 = vpop.permute.xlu0 %176 }
 0x2a0   :  { %v179_v28 = vmul.f32 %v177_v24, %v673_v10 }
 0x2a2   :  { %v180_v29 = vadd.f32 %v179_v28, %v174_v27 }
 0x2a4   :  { %v181_v31 = vadd.f32 %v681_v17, %v180_v29 }
 0x2a6   :  { %197 = vperm.xlu0 %549, %v181_v31   ;;  %591 = vtanh.f32 %v181_v31  ;;  %184 = vperm.xlu1 %546, %v181_v31  }
 0x2ac   :  { %v592_v32 = vpop.eup %591 }
 0x2ad   :  { %191 = vperm.xlu2 %548, %v592_v32  }
 0x2ae   :  { %550 = vset.pattern.permute.xlu1 %v617_v5  ;;  %554 = vset.pattern.permute.xlu0 %v615_v0 }
 0x2af   :  { %203 = vperm.xlu1 %550, %v592_v32  }
 0x2b5   :  { %551 = vset.pattern.permute.xlu2 %v615_v0 }
 0x2b6   :  { %223 = vperm.xlu2 %551, %v521_v34  }
 0x2b7   :  { %552 = vset.pattern.permute.xlu1 %v615_v0 }
 0x2be   :  { %553 = vset.pattern.permute.xlu2 %v616_v3 }
 0x307   :  { %v192_v37 = vpop.permute.xlu2 %191 }
 0x308   :  { %v194_v39 = vmul.f32 %v192_v37, %v696_v26 }
 0x310   :  { %v224_v54 = vpop.permute.xlu2 %223 }
 0x311   :  { %v226_v57 = vmul.f32 %v224_v54, %v669_v8 }
 0x318   :  { %v185_v35 = vpop.permute.xlu1 %184  ;;  %v198_v40 = vpop.permute.xlu0 %197 }
 0x319   :  { %v187_v38 = vmul.f32 %v185_v35, %v694_v25  ;;  %v200_v42 = vmul.f32 %v198_v40, %v700_v30 }
 0x31b   :  { %v195_v41 = vadd.f32 %v194_v39, %v187_v38 }
 0x31d   :  { %v201_v44 = vadd.f32 %v200_v42, %v195_v41  ;;  %v525_v42 = vld [vmem:[%s870_s0 + $0x28] sm:$0xff] }
 0x321   :  { %v204_v43 = vpop.permute.xlu1 %203 }
 0x322   :  { %v206_v45 = vmul.f32 %v204_v43, %v702_v33 }
 0x324   :  { %v207_v46 = vadd.f32 %v206_v45, %v201_v44 }
 0x326   :  { %v208_v47 = vadd.f32 %v708_v36, %v207_v46 }
 0x328   :  { %v211_v48 = vmul.f32 1.442695, %v208_v47  ;;  %v210_v49 = vadd.f32 1.0, %v208_v47  ;;  %vm209_vm3 = vcmp.gt.f32.partialorder %v208_v47, 0.0 }
 0x32a   :  { %593 = vpow2.f32 %v211_v48 }
 0x330   :  { %v594_v50 = vpop.eup %593 }
 0x331   :  { %v213_v51 = vsel %vm209_vm3, %v210_v49, %v594_v50 }
 0x332   :  { %v214_v52 = vadd.f32 1e-15, %v213_v51 }
 0x334   :  { %520 = vst.msk [vmem:[%s876_s6 + $0x10] sm:$0xff] %vm28_vm0, %v214_v52 }
 0x335   :  { %217 = vst.msk [vmem:[#allocation2] sm:$0xff] %vm28_vm0, %v214_v52 }
 0x33c   :  { %v220_v53 = vld [vmem:[#allocation2] sm:$0xff] }
 0x33d   :  { %235 = vperm.xlu2 %553, %v220_v53   ;;  %229 = vperm.xlu1 %552, %v220_v53  }
 0x345   :  { %555 = vset.pattern.permute.xlu2 %v618_v22  ;;  %556 = vset.pattern.permute.xlu1 %v616_v3 }
 0x397   :  { %v236_v55 = vpop.permute.xlu2 %235 }
 0x398   :  { %v238_v59 = vmul.f32 %v236_v55, %v673_v10 }
 0x3af   :  { %v230_v56 = vpop.permute.xlu1 %229 }
 0x3b0   :  { %v232_v58 = vmul.f32 %v230_v56, %v671_v9 }
 0x3b2   :  { %v233_v60 = vadd.f32 %v232_v58, %v226_v57 }
 0x3b4   :  { %v239_v61 = vadd.f32 %v238_v59, %v233_v60 }
 0x3b6   :  { %v240_v62 = vadd.f32 %v681_v17, %v239_v61 }
 0x3b8   :  { %256 = vperm.xlu2 %555, %v240_v62   ;;  %595 = vtanh.f32 %v240_v62  ;;  %243 = vperm.xlu0 %554, %v240_v62  }
 0x3be   :  { %v596_v63 = vpop.eup %595 }
 0x3bf   :  { %250 = vperm.xlu1 %556, %v596_v63  }
 0x3c0   :  { %558 = vset.pattern.permute.xlu2 %v615_v0 }
 0x3c1   :  { %282 = vperm.xlu2 %558, %v523_v11  }
 0x3c7   :  { %557 = vset.pattern.permute.xlu1 %v617_v5 }
 0x3c8   :  { %262 = vperm.xlu1 %557, %v596_v63  }
 0x3d0   :  { %559 = vset.pattern.permute.xlu1 %v616_v3 }
 0x412   :  { %v257_v7 = vpop.permute.xlu2 %256 }
 0x413   :  { %v259_v13 = vmul.f32 %v257_v7, %v700_v30 }
 0x41b   :  { %v283_v29 = vpop.permute.xlu2 %282 }
 0x41c   :  { %v285_v31 = vmul.f32 %v283_v29, %v669_v8 }
 0x42a   :  { %v244_v2 = vpop.permute.xlu0 %243 }
 0x42b   :  { %v246_v6 = vmul.f32 %v244_v2, %v694_v25 }
 0x431   :  { %v251_v1 = vpop.permute.xlu1 %250 }
 0x432   :  { %v253_v4 = vmul.f32 %v251_v1, %v696_v26 }
 0x434   :  { %v254_v12 = vadd.f32 %v253_v4, %v246_v6 }
 0x436   :  { %v260_v15 = vadd.f32 %v259_v13, %v254_v12  ;;  %v527_v13 = vld [vmem:[%s870_s0 + $0x30] sm:$0xff] }
 0x43a   :  { %v263_v14 = vpop.permute.xlu1 %262 }
 0x43b   :  { %v265_v16 = vmul.f32 %v263_v14, %v702_v33 }
 0x43d   :  { %v266_v18 = vadd.f32 %v265_v16, %v260_v15 }
 0x43f   :  { %v267_v19 = vadd.f32 %v708_v36, %v266_v18 }
 0x441   :  { %v270_v20 = vmul.f32 1.442695, %v267_v19  ;;  %v269_v21 = vadd.f32 1.0, %v267_v19  ;;  %vm268_vm4 = vcmp.gt.f32.partialorder %v267_v19, 0.0 }
 0x443   :  { %597 = vpow2.f32 %v270_v20 }
 0x449   :  { %v598_v23 = vpop.eup %597 }
 0x44a   :  { %v272_v24 = vsel %vm268_vm4, %v269_v21, %v598_v23 }
 0x44b   :  { %v273_v27 = vadd.f32 1e-15, %v272_v24 }
 0x44d   :  { %522 = vst.msk [vmem:[%s876_s6 + $0x18] sm:$0xff] %vm28_vm0, %v273_v27 }
 0x44e   :  { %276 = vst.msk [vmem:[#allocation2] sm:$0xff] %vm28_vm0, %v273_v27 }
 0x455   :  { %v279_v28 = vld [vmem:[#allocation2] sm:$0xff] }
 0x456   :  { %294 = vperm.xlu1 %559, %v279_v28   ;;  %288 = vperm.xlu0 %554, %v279_v28  }
 0x45e   :  { %561 = vset.pattern.permute.xlu1 %v618_v22  ;;  %560 = vset.pattern.permute.xlu0 %v616_v3 }
 0x4c8   :  { %v295_v32 = vpop.permute.xlu1 %294  ;;  %v289_v34 = vpop.permute.xlu0 %288 }
 0x4c9   :  { %v291_v35 = vmul.f32 %v289_v34, %v671_v9  ;;  %v297_v37 = vmul.f32 %v295_v32, %v673_v10 }
 0x4cb   :  { %v292_v38 = vadd.f32 %v291_v35, %v285_v31 }
 0x4cd   :  { %v298_v39 = vadd.f32 %v297_v37, %v292_v38 }
 0x4cf   :  { %v299_v40 = vadd.f32 %v681_v17, %v298_v39 }
 0x4d1   :  { %315 = vperm.xlu1 %561, %v299_v40   ;;  %599 = vtanh.f32 %v299_v40  ;;  %302 = vperm.xlu2 %558, %v299_v40  }
 0x4d7   :  { %v600_v41 = vpop.eup %599 }
 0x4d8   :  { %309 = vperm.xlu0 %560, %v600_v41  }
 0x4d9   :  { %562 = vset.pattern.permute.xlu2 %v617_v5  ;;  %563 = vset.pattern.permute.xlu1 %v615_v0 }
 0x4da   :  { %321 = vperm.xlu2 %562, %v600_v41   ;;  %341 = vperm.xlu1 %563, %v525_v42  }
 0x4e2   :  { %564 = vset.pattern.permute.xlu2 %v615_v0 }
 0x52b   :  { %v303_v43 = vpop.permute.xlu2 %302 }
 0x52c   :  { %v305_v46 = vmul.f32 %v303_v43, %v694_v25 }
 0x534   :  { %v322_v48 = vpop.permute.xlu2 %321 }
 0x535   :  { %v324_v51 = vmul.f32 %v322_v48, %v702_v33 }
 0x543   :  { %v316_v44 = vpop.permute.xlu1 %315 }
 0x544   :  { %v318_v49 = vmul.f32 %v316_v44, %v700_v30 }
 0x54a   :  { %v310_v45 = vpop.permute.xlu0 %309 }
 0x54b   :  { %v312_v47 = vmul.f32 %v310_v45, %v696_v26 }
 0x54c   :  { %v342_v61 = vpop.permute.xlu1 %341 }
 0x54d   :  { %v313_v50 = vadd.f32 %v312_v47, %v305_v46  ;;  %v344_v63 = vmul.f32 %v342_v61, %v669_v8 }
 0x54f   :  { %v319_v52 = vadd.f32 %v318_v49, %v313_v50 }
 0x551   :  { %v325_v53 = vadd.f32 %v324_v51, %v319_v52 }
 0x553   :  { %v326_v54 = vadd.f32 %v708_v36, %v325_v53 }
 0x555   :  { %v329_v55 = vmul.f32 1.442695, %v326_v54  ;;  %v328_v56 = vadd.f32 1.0, %v326_v54  ;;  %vm327_vm5 = vcmp.gt.f32.partialorder %v326_v54, 0.0  ;;  %v529_v54 = vld [vmem:[%s870_s0 + $0x38] sm:$0xff] }
 0x557   :  { %601 = vpow2.f32 %v329_v55 }
 0x55d   :  { %v602_v57 = vpop.eup %601 }
 0x55e   :  { %v331_v58 = vsel %vm327_vm5, %v328_v56, %v602_v57 }
 0x55f   :  { %v332_v59 = vadd.f32 1e-15, %v331_v58 }
 0x561   :  { %524 = vst.msk [vmem:[%s876_s6 + $0x20] sm:$0xff] %vm28_vm0, %v332_v59 }
 0x562   :  { %335 = vst.msk [vmem:[#allocation2] sm:$0xff] %vm28_vm0, %v332_v59 }
 0x569   :  { %v338_v60 = vld [vmem:[#allocation2] sm:$0xff] }
 0x56a   :  { %353 = vperm.xlu0 %560, %v338_v60   ;;  %347 = vperm.xlu2 %564, %v338_v60  }
 0x572   :  { %566 = vset.pattern.permute.xlu0 %v618_v22  ;;  %565 = vset.pattern.permute.xlu2 %v616_v3 }
 0x5c4   :  { %v348_v62 = vpop.permute.xlu2 %347 }
 0x5c5   :  { %v350_v1 = vmul.f32 %v348_v62, %v671_v9 }
 0x5c7   :  { %v351_v4 = vadd.f32 %v350_v1, %v344_v63 }
 0x5dc   :  { %v354_v2 = vpop.permute.xlu0 %353 }
 0x5dd   :  { %v356_v6 = vmul.f32 %v354_v2, %v673_v10 }
 0x5df   :  { %v357_v7 = vadd.f32 %v356_v6, %v351_v4 }
 0x5e1   :  { %v358_v11 = vadd.f32 %v681_v17, %v357_v7 }
 0x5e3   :  { %374 = vperm.xlu0 %566, %v358_v11   ;;  %603 = vtanh.f32 %v358_v11  ;;  %361 = vperm.xlu1 %563, %v358_v11  }
 0x5e9   :  { %v604_v12 = vpop.eup %603 }
 0x5ea   :  { %368 = vperm.xlu2 %565, %v604_v12  }
 0x5eb   :  { %567 = vset.pattern.permute.xlu1 %v617_v5  ;;  %571 = vset.pattern.permute.xlu0 %v615_v0 }
 0x5ec   :  { %380 = vperm.xlu1 %567, %v604_v12  }
 0x5f2   :  { %568 = vset.pattern.permute.xlu2 %v615_v0 }
 0x5f3   :  { %400 = vperm.xlu2 %568, %v527_v13  }
 0x5f4   :  { %569 = vset.pattern.permute.xlu1 %v615_v0 }
 0x5fb   :  { %570 = vset.pattern.permute.xlu2 %v616_v3 }
 0x644   :  { %v369_v15 = vpop.permute.xlu2 %368 }
 0x645   :  { %v371_v18 = vmul.f32 %v369_v15, %v696_v26 }
 0x64d   :  { %v401_v39 = vpop.permute.xlu2 %400 }
 0x64e   :  { %v403_v42 = vmul.f32 %v401_v39, %v669_v8 }
 0x655   :  { %v362_v14 = vpop.permute.xlu1 %361  ;;  %v375_v19 = vpop.permute.xlu0 %374 }
 0x656   :  { %v364_v16 = vmul.f32 %v362_v14, %v694_v25  ;;  %v377_v21 = vmul.f32 %v375_v19, %v700_v30 }
 0x658   :  { %v372_v20 = vadd.f32 %v371_v18, %v364_v16 }
 0x65a   :  { %v378_v24 = vadd.f32 %v377_v21, %v372_v20 }
 0x65e   :  { %v381_v23 = vpop.permute.xlu1 %380 }
 0x65f   :  { %v383_v27 = vmul.f32 %v381_v23, %v702_v33 }
 0x661   :  { %v384_v28 = vadd.f32 %v383_v27, %v378_v24 }
 0x663   :  { %v385_v29 = vadd.f32 %v708_v36, %v384_v28 }
 0x665   :  { %v388_v31 = vmul.f32 1.442695, %v385_v29  ;;  %v387_v32 = vadd.f32 1.0, %v385_v29  ;;  %vm386_vm6 = vcmp.gt.f32.partialorder %v385_v29, 0.0 }
 0x667   :  { %605 = vpow2.f32 %v388_v31 }
 0x66d   :  { %v606_v34 = vpop.eup %605 }
 0x66e   :  { %v390_v35 = vsel %vm386_vm6, %v387_v32, %v606_v34 }
 0x66f   :  { %v391_v37 = vadd.f32 1e-15, %v390_v35 }
 0x671   :  { %526 = vst.msk [vmem:[%s876_s6 + $0x28] sm:$0xff] %vm28_vm0, %v391_v37 }
 0x672   :  { %394 = vst.msk [vmem:[#allocation2] sm:$0xff] %vm28_vm0, %v391_v37 }
 0x679   :  { %v397_v38 = vld [vmem:[#allocation2] sm:$0xff] }
 0x67a   :  { %412 = vperm.xlu2 %570, %v397_v38   ;;  %406 = vperm.xlu1 %569, %v397_v38  }
 0x682   :  { %572 = vset.pattern.permute.xlu2 %v618_v22  ;;  %573 = vset.pattern.permute.xlu1 %v616_v3 }
 0x6d4   :  { %v413_v40 = vpop.permute.xlu2 %412 }
 0x6d5   :  { %v415_v44 = vmul.f32 %v413_v40, %v673_v10 }
 0x6ec   :  { %v407_v41 = vpop.permute.xlu1 %406 }
 0x6ed   :  { %v409_v43 = vmul.f32 %v407_v41, %v671_v9 }
 0x6ef   :  { %v410_v45 = vadd.f32 %v409_v43, %v403_v42 }
 0x6f1   :  { %v416_v46 = vadd.f32 %v415_v44, %v410_v45 }
 0x6f3   :  { %v417_v47 = vadd.f32 %v681_v17, %v416_v46 }
 0x6f5   :  { %433 = vperm.xlu2 %572, %v417_v47   ;;  %607 = vtanh.f32 %v417_v47  ;;  %420 = vperm.xlu0 %571, %v417_v47  }
 0x6fb   :  { %v608_v48 = vpop.eup %607 }
 0x6fc   :  { %427 = vperm.xlu1 %573, %v608_v48  }
 0x6fd   :  { %575 = vset.pattern.permute.xlu2 %v615_v0 }
 0x6fe   :  { %459 = vperm.xlu2 %575, %v529_v54  }
 0x704   :  { %574 = vset.pattern.permute.xlu1 %v617_v5 }
 0x705   :  { %439 = vperm.xlu1 %574, %v608_v48  }
 0x70d   :  { %576 = vset.pattern.permute.xlu1 %v616_v3 }
 0x74f   :  { %v434_v53 = vpop.permute.xlu2 %433 }
 0x750   :  { %v436_v0 = vmul.f32 %v434_v53, %v700_v30 }
 0x758   :  { %v460_v6 = vpop.permute.xlu2 %459 }
 0x759   :  { %v462_v7 = vmul.f32 %v460_v6, %v669_v8 }
 0x767   :  { %v421_v50 = vpop.permute.xlu0 %420 }
 0x768   :  { %v423_v52 = vmul.f32 %v421_v50, %v694_v25 }
 0x76e   :  { %v428_v49 = vpop.permute.xlu1 %427 }
 0x76f   :  { %v430_v51 = vmul.f32 %v428_v49, %v696_v26 }
 0x771   :  { %v431_v55 = vadd.f32 %v430_v51, %v423_v52 }
 0x773   :  { %v437_v57 = vadd.f32 %v436_v0, %v431_v55 }
 0x777   :  { %v440_v56 = vpop.permute.xlu1 %439 }
 0x778   :  { %v442_v58 = vmul.f32 %v440_v56, %v702_v33 }
 0x77a   :  { %v443_v59 = vadd.f32 %v442_v58, %v437_v57 }
 0x77c   :  { %v444_v60 = vadd.f32 %v708_v36, %v443_v59 }
 0x77e   :  { %v447_v61 = vmul.f32 1.442695, %v444_v60  ;;  %v446_v62 = vadd.f32 1.0, %v444_v60  ;;  %vm445_vm7 = vcmp.gt.f32.partialorder %v444_v60, 0.0 }
 0x780   :  { %609 = vpow2.f32 %v447_v61 }
 0x786   :  { %v610_v63 = vpop.eup %609 }
 0x787   :  { %v449_v1 = vsel %vm445_vm7, %v446_v62, %v610_v63 }
 0x788   :  { %v450_v2 = vadd.f32 1e-15, %v449_v1 }
 0x78a   :  { %528 = vst.msk [vmem:[%s876_s6 + $0x30] sm:$0xff] %vm28_vm0, %v450_v2 }
 0x78b   :  { %453 = vst.msk [vmem:[#allocation2] sm:$0xff] %vm28_vm0, %v450_v2 }
 0x792   :  { %v456_v4 = vld [vmem:[#allocation2] sm:$0xff] }
 0x793   :  { %471 = vperm.xlu1 %576, %v456_v4   ;;  %465 = vperm.xlu0 %571, %v456_v4  }
 0x79b   :  { %578 = vset.pattern.permute.xlu1 %v618_v22  ;;  %577 = vset.pattern.permute.xlu0 %v616_v3 }
 0x805   :  { %v472_v11 = vpop.permute.xlu1 %471  ;;  %v466_v12 = vpop.permute.xlu0 %465 }
 0x806   :  { %v468_v13 = vmul.f32 %v466_v12, %v671_v9  ;;  %v474_v14 = vmul.f32 %v472_v11, %v673_v10 }
 0x808   :  { %v469_v15 = vadd.f32 %v468_v13, %v462_v7 }
 0x80a   :  { %v475_v16 = vadd.f32 %v474_v14, %v469_v15 }
 0x80c   :  { %v476_v18 = vadd.f32 %v681_v17, %v475_v16 }
 0x80e   :  { %492 = vperm.xlu1 %578, %v476_v18   ;;  %611 = vtanh.f32 %v476_v18  ;;  %479 = vperm.xlu2 %575, %v476_v18  }
 0x814   :  { %v612_v19 = vpop.eup %611 }
 0x815   :  { %486 = vperm.xlu0 %577, %v612_v19  }
 0x816   :  { %579 = vset.pattern.permute.xlu2 %v617_v5 }
 0x817   :  { %498 = vperm.xlu2 %579, %v612_v19  }
 0x81d   :  { %580 = vset.pattern.permute.xlu0 %v617_v5 }
 0x868   :  { %v480_v3 = vpop.permute.xlu2 %479 }
 0x869   :  { %v482_v9 = vmul.f32 %v480_v3, %v694_v25 }
 0x871   :  { %v499_v20 = vpop.permute.xlu2 %498 }
 0x872   :  { %v501_v23 = vmul.f32 %v499_v20, %v702_v33 }
 0x880   :  { %v493_v8 = vpop.permute.xlu1 %492 }
 0x881   :  { %v495_v17 = vmul.f32 %v493_v8, %v700_v30 }
 0x887   :  { %v487_v22 = vpop.permute.xlu0 %486 }
 0x888   :  { %v489_v10 = vmul.f32 %v487_v22, %v696_v26 }
 0x88a   :  { %v490_v21 = vadd.f32 %v489_v10, %v482_v9 }
 0x88c   :  { %v496_v24 = vadd.f32 %v495_v17, %v490_v21 }
 0x88e   :  { %v502_v27 = vadd.f32 %v501_v23, %v496_v24 }
 0x890   :  { %v503_v28 = vadd.f32 %v708_v36, %v502_v27 }
 0x892   :  { %v506_v29 = vmul.f32 1.442695, %v503_v28  ;;  %v505_v5 = vadd.f32 1.0, %v503_v28  ;;  %vm504_vm8 = vcmp.gt.f32.partialorder %v503_v28, 0.0 }
 0x894   :  { %613 = vpow2.f32 %v506_v29 }
 0x89a   :  { %v614_v31 = vpop.eup %613 }
 0x89b   :  { %v508_v32 = vsel %vm504_vm8, %v505_v5, %v614_v31 }
 0x89c   :  { %v509_v34 = vadd.f32 1e-15, %v508_v32 }
 0x89e   :  { %530 = vst.msk [vmem:[%s876_s6 + $0x38] sm:$0xff] %vm28_vm0, %v509_v34 }
 0x89f   :  { %512 = vst.msk [vmem:[#allocation2] sm:$0xff] %vm28_vm0, %v509_v34 }

</bundles_post_ra>
